<compile_context>
chip_gen: v5e
topology: v5e:2x2
jax: 0.10.0
libtpu: 0.0.40
codegen_flags: <defaults>
</compile_context>

<pallas_src>
import math

import jax
import jax.numpy as jnp
from jax.experimental import pallas as pl
from jax.experimental.pallas import tpu as pltpu


# ----------------------------------------------------------------------------
# Fused kernel:
#   grid = (N//tm, N//tk);  i = output row tile, k = contraction tile
#   acc[i]     += adj[i,k] @ h[k]                    (k loop, f32 accumulator)
#   at last k:   node_emb = relu(acc + b_enc)        (stays in VMEM)
#                out[i]   = node_emb @ [W_fea | w_src | w_dst] + [b_fea | 0 0]
# ----------------------------------------------------------------------------
def fused_view_learner_kernel(adj_ref, h_ref, b_enc_ref, w_cat_ref, b_cat_ref,
                              out_ref, acc_ref):
    k = pl.program_id(1)

    @pl.when(k == 0)
    def _():
        acc_ref[...] = jnp.zeros_like(acc_ref)

    h_t = h_ref[...]
    adj_t = adj_ref[...]
    if adj_t.dtype != h_t.dtype:
        # int8-stored adjacency: upcast to the MXU dtype (bf16) on the VPU.
        # The kernel is DMA-bound, so this cast rides in otherwise-idle VALU
        # slots; 0/1 values are exact.  (No int MXU path on v7x, so always
        # present bf16/f32 operands to the MXU.)
        adj_t = adj_t.astype(h_t.dtype)
    acc_ref[...] += jnp.dot(adj_t, h_t, preferred_element_type=jnp.float32)

    @pl.when(k == pl.num_programs(1) - 1)
    def _():
        node_emb = jnp.maximum(acc_ref[...] + b_enc_ref[...], 0.0)
        out_ref[...] = (jnp.dot(node_emb, w_cat_ref[...],
                                preferred_element_type=jnp.float32)
                        + b_cat_ref[...]).astype(out_ref.dtype)


def _pick_tile(n, target, multiple):
    """Largest tile <= min(target, n) that divides n and is a multiple of
    `multiple`.  Caller guarantees n % multiple == 0 (or n < 128, in which
    case a full-extent block is used instead)."""
    cap = min(target, n)
    t = (cap // multiple) * multiple
    while t >= multiple:
        if n % t == 0:
            return t
        t -= multiple
    return n


def fused_view_learner(adj, h, b_enc, w_cat, b_cat, *,
                       tm=1024, tk=2048, adj_buffers=2):
    """adj: [N,N] (f32/bf16/int8, stored persistently by the caller);
    h = x @ W_enc already cast to the MXU dtype; w_cat = [W_fea | w_src | w_dst];
    b_cat = [b_fea | 0 0].  Returns [N, F+2] = [fea_logits | sd]."""
    n = adj.shape[0]
    hdim = h.shape[1]
    fo = w_cat.shape[1]          # F + 2

    # Pad node count to a multiple of 128 so adjacency blocks satisfy Mosaic's
    # (sublane, 128-lane) tiling for every storage dtype.  Zero rows/cols do
    # not change the math.  (Build adj pre-padded at scale to avoid this copy.)
    if n >= 128 and n % 128 != 0:
        n_pad = ((n + 127) // 128) * 128
        adj = jnp.pad(adj, ((0, n_pad - n), (0, n_pad - n)))
        h = jnp.pad(h, ((0, n_pad - n), (0, 0)))
    else:
        n_pad = n

    if n_pad < 128:
        # Tiny graph: single full-extent block (Mosaic pads internally).
        tm = tk = n_pad
    else:
        tm = _pick_tile(n_pad, tm, 128)
        tk = _pick_tile(n_pad, tk, 128)
        if n_pad // tm < 2:
            # Keep >= 2 row tiles so the "parallel" axis shards across v7x's
            # 2 TensorCores instead of collapsing onto one.
            tm = _pick_tile(n_pad, max(128, n_pad // 2), 128)
    ni, nk = n_pad // tm, n_pad // tk

    adj_spec_kwargs = {}
    if adj_buffers > 2:
        # Optional 3-deep pipelining on the DMA-critical adjacency stream.
        adj_spec_kwargs["pipeline_mode"] = pl.Buffered(adj_buffers)

    grid_spec = pltpu.PrefetchScalarGridSpec(
        num_scalar_prefetch=0,
        grid=(ni, nk),
        in_specs=[
            pl.BlockSpec((tm, tk), lambda i, k: (i, k), **adj_spec_kwargs),
            pl.BlockSpec((tk, hdim), lambda i, k: (k, 0)),   # h k-tile
            pl.BlockSpec((1, hdim), lambda i, k: (0, 0)),    # b_enc
            pl.BlockSpec((hdim, fo), lambda i, k: (0, 0)),   # [W_fea | w_s | w_d]
            pl.BlockSpec((1, fo), lambda i, k: (0, 0)),      # [b_fea | 0 0]
        ],
        out_specs=pl.BlockSpec((tm, fo), lambda i, k: (i, 0)),
        scratch_shapes=[pltpu.VMEM((tm, hdim), jnp.float32)],
    )

    # Advisory cost estimate so XLA schedules the edge-gather glue around the
    # long-running kernel instead of serializing.
    adj_bytes = adj.dtype.itemsize
    h_bytes = h.dtype.itemsize
    cost = pl.CostEstimate(
        flops=2 * n_pad * n_pad * hdim + 2 * n_pad * hdim * fo,
        transcendentals=0,
        bytes_accessed=(n_pad * n_pad * adj_bytes + n_pad * hdim * h_bytes
                        + n_pad * fo * 4 + (hdim * fo + hdim + fo + hdim) * 4),
    )

    compiler_kwargs = dict(dimension_semantics=("parallel", "arbitrary"))
    est_vmem = (adj_buffers * tm * tk * adj_bytes        # adj buffers
                + 2 * tk * hdim * h_bytes                # h double buffer
                + tm * hdim * 4                          # accumulator
                + 2 * tm * fo * 4                        # output double buffer
                + 2 * (hdim * fo + hdim + fo + hdim) * 4)
    if est_vmem > 16 * 1024 * 1024:
        # Above v5e's 16 MiB scoped default: raise the limit explicitly.
        # (Cap at v7x's 64 MiB physical VMEM; shrink tiles beyond that.)
        compiler_kwargs["vmem_limit_bytes"] = min(est_vmem + (8 << 20), 64 << 20)

    out = pl.pallas_call(
        fused_view_learner_kernel,
        out_shape=jax.ShapeDtypeStruct((n_pad, fo), jnp.float32),
        grid_spec=grid_spec,
        cost_estimate=cost,
        compiler_params=pltpu.CompilerParams(**compiler_kwargs),
    )(adj, h, b_enc, w_cat, b_cat)
    return out[:n]


# ----------------------------------------------------------------------------
# ViewLearner forward
# ----------------------------------------------------------------------------
def view_learner_forward(params, x, adj, edge_index, *, tm=1024, tk=2048,
                         adj_buffers=2):
    hdim = params["w_enc"].shape[1]
    f = params["w_fea"].shape[1]

    # MXU dtype follows the adjacency storage dtype; int8 adj is upcast to
    # bf16 inside the kernel, so prepare h in bf16 to match.
    if jnp.issubdtype(adj.dtype, jnp.integer):
        mxu_dtype = jnp.bfloat16
    else:
        mxu_dtype = adj.dtype

    # Hoisted skinny matmul (N*H bytes of HBM traffic, noise vs the N^2 adj stream).
    h = (x @ params["w_enc"]).astype(mxu_dtype)

    # Fused epilogue weights: [W_fea | w_src | w_dst]  -> one MXU call, one output.
    w_sd = jnp.concatenate(
        [params["w_edge"][:hdim], params["w_edge"][hdim:]], axis=1)     # (H, 2)
    w_cat = jnp.concatenate([params["w_fea"], w_sd], axis=1)            # (H, F+2)
    b_cat = jnp.concatenate(
        [params["b_fea"], jnp.zeros((1, 2), jnp.float32)], axis=1)      # (1, F+2)

    out = fused_view_learner(adj, h, params["b_enc"], w_cat, b_cat,
                             tm=tm, tk=tk, adj_buffers=adj_buffers)
    fea_logits = out[:, :f]
    sd = out[:, f:]

    # edge_logits[e] = node_emb[src[e]] @ w_edge[:H]
    #                + node_emb[dst[e]] @ w_edge[H:] + b_edge
    # Data-dependent gather-add stays as JAX glue on [N]-sized vectors; the
    # algebraic rewrite avoids ever materializing the [E, 2H] edge_emb tensor.
    src, dst = edge_index[0], edge_index[1]
    edge_logits = (sd[:, 0][src] + sd[:, 1][dst]
                   + params["b_edge"][0, 0])[:, None]
    return edge_logits, fea_logits


# ----------------------------------------------------------------------------
# Deterministic parameter init (xavier_uniform weights, zero biases)
# ----------------------------------------------------------------------------
def xavier_uniform(key, fan_in, fan_out):
    bound = math.sqrt(6.0 / (fan_in + fan_out))
    return jax.random.uniform(
        key, (fan_in, fan_out), minval=-bound, maxval=bound, dtype=jnp.float32)


def init_params(key, msk_fea_dim, hid_units):
    k_enc, k_edge, k_fea = jax.random.split(key, 3)
    return {
        # synthetic encoder (not part of ViewLearner.__init__; passed in PyTorch)
        # TODO(synk): the real encoder is an arbitrary external module; a
        # 1-layer dense GCN stands in for it here.
        "w_enc": xavier_uniform(k_enc, msk_fea_dim, hid_units),
        "b_enc": jnp.zeros((1, hid_units), jnp.float32),
        # mlp_edge_model: Linear(2*hid_units, 1)
        "w_edge": xavier_uniform(k_edge, 2 * hid_units, 1),
        "b_edge": jnp.zeros((1, 1), jnp.float32),
        # mlp_fea_masking_model: Linear(hid_units, msk_fea_dim)
        "w_fea": xavier_uniform(k_fea, hid_units, msk_fea_dim),
        "b_fea": jnp.zeros((1, msk_fea_dim), jnp.float32),
    }


# ----------------------------------------------------------------------------
if __name__ == "__main__":
    MSK_FEA_DIM = 16
    HID_UNITS = 32
    N_NODES = 256
    N_EDGES = 512

    key = jax.random.PRNGKey(0)
    k_x, k_adj, k_ei, k_params = jax.random.split(key, 4)

    x = jax.random.normal(k_x, (N_NODES, MSK_FEA_DIM), dtype=jnp.float32)
    adj_f32 = (jax.random.uniform(k_adj, (N_NODES, N_NODES)) > 0.5
               ).astype(jnp.float32)
    # Persisted low-precision adjacency copies: built ONCE, reused every
    # forward (0/1 is exact in bf16 and int8) — no per-call cast in the wrapper.
    adj_bf16 = adj_f32.astype(jnp.bfloat16)
    adj_i8 = adj_f32.astype(jnp.int8)
    edge_index = jax.random.randint(k_ei, (2, N_EDGES), 0, N_NODES,
                                    dtype=jnp.int32)

    params = init_params(k_params, MSK_FEA_DIM, HID_UNITS)

    # Pure-JAX reference
    node_emb_ref = jnp.maximum(adj_f32 @ (x @ params["w_enc"])
                               + params["b_enc"], 0.0)
    edge_emb_ref = jnp.concatenate(
        [node_emb_ref[edge_index[0]], node_emb_ref[edge_index[1]]], axis=1)
    edge_ref = edge_emb_ref @ params["w_edge"] + params["b_edge"]
    fea_ref = node_emb_ref @ params["w_fea"] + params["b_fea"]

    # 1) f32 adjacency path (exact math)
    edge_logits, fea_logits = view_learner_forward(params, x, adj_f32, edge_index)
    jax.block_until_ready((edge_logits, fea_logits))
    assert edge_logits.shape == (N_EDGES, 1)
    assert fea_logits.shape == (N_NODES, MSK_FEA_DIM)
    assert jnp.allclose(edge_logits, edge_ref, atol=1e-3)
    assert jnp.allclose(fea_logits, fea_ref, atol=1e-3)

    # 2) bf16-persisted adjacency: half the HBM bytes on the dominant stream.
    edge_bf, fea_bf = view_learner_forward(params, x, adj_bf16, edge_index)
    jax.block_until_ready((edge_bf, fea_bf))
    assert jnp.allclose(edge_bf, edge_ref, rtol=5e-2, atol=0.5)
    assert jnp.allclose(fea_bf, fea_ref, rtol=5e-2, atol=0.5)

    # 3) int8-persisted adjacency (quarter the HBM bytes; bf16 upcast in-kernel),
    #    with explicit 128x128 tiles to exercise the (row, k) accumulation grid.
    edge_i8, fea_i8 = view_learner_forward(params, x, adj_i8, edge_index,
                                           tm=128, tk=128)
    jax.block_until_ready((edge_i8, fea_i8))
    assert jnp.allclose(edge_i8, edge_ref, rtol=5e-2, atol=0.5)
    assert jnp.allclose(fea_i8, fea_ref, rtol=5e-2, atol=0.5)

    print("KERNEL_OK")
</pallas_src>

<mosaic_0001>
module attributes {stable_mosaic.version = 11 : i64} {
  func.func @fused_view_learner_kernel(%arg0: i32, %arg1: i32, %arg2: memref<128x256xf32, #tpu.memory_space<vmem>>, %arg3: memref<256x32xf32, #tpu.memory_space<vmem>>, %arg4: memref<1x32xf32, #tpu.memory_space<vmem>>, %arg5: memref<32x18xf32, #tpu.memory_space<vmem>>, %arg6: memref<1x18xf32, #tpu.memory_space<vmem>>, %arg7: memref<128x18xf32, #tpu.memory_space<vmem>>, %arg8: memref<128x32xf32, #tpu.memory_space<vmem>>) attributes {dimension_semantics = [#tpu.dimension_semantics<parallel>, #tpu.dimension_semantics<arbitrary>], iteration_bounds = array<i64: 2, 1>, scalar_prefetch = 0 : i64, scratch_operands = 1 : i64, tpu.core_type = #tpu.core_type<tc>, window_params = [{transform_indices = @transform_0, window_bounds = array<i64: 128, 256>}, {transform_indices = @transform_1, window_bounds = array<i64: 256, 32>}, {pipeline_mode = #tpu.pipeline_mode<synchronous>, transform_indices = @transform_2, window_bounds = array<i64: 1, 32>}, {pipeline_mode = #tpu.pipeline_mode<synchronous>, transform_indices = @transform_3, window_bounds = array<i64: 32, 18>}, {pipeline_mode = #tpu.pipeline_mode<synchronous>, transform_indices = @transform_4, window_bounds = array<i64: 1, 18>}, {transform_indices = @transform_5, window_bounds = array<i64: 128, 18>}]} {
    %c0_i32 = arith.constant 0 : i32
    %0 = arith.cmpi eq, %arg1, %c0_i32 : i32
    %1 = arith.extui %0 : i1 to i32
    %c0_i32_0 = arith.constant 0 : i32
    %2 = arith.cmpi ne, %1, %c0_i32_0 : i32
    scf.if %2 {
      %cst_10 = arith.constant 0.000000e+00 : f32
      %12 = vector.broadcast %cst_10 : f32 to vector<128x32xf32>
      %c0_11 = arith.constant 0 : index
      %c0_12 = arith.constant 0 : index
      %13 = vector.load %arg8[%c0_11, %c0_12] : memref<128x32xf32, #tpu.memory_space<vmem>>, vector<128x32xf32>
      tpu.vector_store %arg8[%c0_11, %c0_12], %12 {strides = array<i32>} : memref<128x32xf32, #tpu.memory_space<vmem>>, vector<128x32xf32>,
    } else {
    }
    %c0 = arith.constant 0 : index
    %c0_1 = arith.constant 0 : index
    %3 = vector.load %arg3[%c0, %c0_1] : memref<256x32xf32, #tpu.memory_space<vmem>>, vector<256x32xf32>
    %c0_2 = arith.constant 0 : index
    %c0_3 = arith.constant 0 : index
    %4 = vector.load %arg2[%c0_2, %c0_3] : memref<128x256xf32, #tpu.memory_space<vmem>>, vector<128x256xf32>
    %c0_4 = arith.constant 0 : index
    %c0_5 = arith.constant 0 : index
    %5 = vector.load %arg8[%c0_4, %c0_5] : memref<128x32xf32, #tpu.memory_space<vmem>>, vector<128x32xf32>
    %cst = arith.constant dense<0.000000e+00> : vector<128x32xf32>
    %6 = tpu.matmul %4, %3, %cst {dimension_numbers = #tpu.dot_dimension_numbers<[1], [0], [0], [1], [0, 0, 1, 1], [], []>} : vector<128x256xf32>, vector<256x32xf32>, vector<128x32xf32> -> vector<128x32xf32>
    %7 = arith.addf %5, %6 : vector<128x32xf32>
    %c0_6 = arith.constant 0 : index
    %c0_7 = arith.constant 0 : index
    %8 = vector.load %arg8[%c0_6, %c0_7] : memref<128x32xf32, #tpu.memory_space<vmem>>, vector<128x32xf32>
    tpu.vector_store %arg8[%c0_6, %c0_7], %7 {strides = array<i32>} : memref<128x32xf32, #tpu.memory_space<vmem>>, vector<128x32xf32>,
    %c0_i32_8 = arith.constant 0 : i32
    %9 = arith.cmpi eq, %arg1, %c0_i32_8 : i32
    %10 = arith.extui %9 : i1 to i32
    %c0_i32_9 = arith.constant 0 : i32
    %11 = arith.cmpi ne, %10, %c0_i32_9 : i32
    scf.if %11 {
      %c0_10 = arith.constant 0 : index
      %c0_11 = arith.constant 0 : index
      %12 = vector.load %arg8[%c0_10, %c0_11] : memref<128x32xf32, #tpu.memory_space<vmem>>, vector<128x32xf32>
      %c0_12 = arith.constant 0 : index
      %c0_13 = arith.constant 0 : index
      %13 = vector.load %arg4[%c0_12, %c0_13] : memref<1x32xf32, #tpu.memory_space<vmem>>, vector<1x32xf32>
      %14 = vector.broadcast %13 : vector<1x32xf32> to vector<128x32xf32>
      %15 = arith.addf %12, %14 : vector<128x32xf32>
      %cst_14 = arith.constant 0.000000e+00 : f32
      %16 = vector.broadcast %cst_14 : f32 to vector<128x32xf32>
      %17 = arith.maximumf %15, %16 : vector<128x32xf32>
      %c0_15 = arith.constant 0 : index
      %c0_16 = arith.constant 0 : index
      %18 = vector.load %arg5[%c0_15, %c0_16] : memref<32x18xf32, #tpu.memory_space<vmem>>, vector<32x18xf32>
      %cst_17 = arith.constant dense<0.000000e+00> : vector<128x18xf32>
      %19 = tpu.matmul %17, %18, %cst_17 {dimension_numbers = #tpu.dot_dimension_numbers<[1], [0], [0], [1], [0, 0, 1, 1], [], []>} : vector<128x32xf32>, vector<32x18xf32>, vector<128x18xf32> -> vector<128x18xf32>
      %c0_18 = arith.constant 0 : index
      %c0_19 = arith.constant 0 : index
      %20 = vector.load %arg6[%c0_18, %c0_19] : memref<1x18xf32, #tpu.memory_space<vmem>>, vector<1x18xf32>
      %21 = vector.broadcast %20 : vector<1x18xf32> to vector<128x18xf32>
      %22 = arith.addf %19, %21 : vector<128x18xf32>
      %c0_20 = arith.constant 0 : index
      %c0_21 = arith.constant 0 : index
      %23 = vector.load %arg7[%c0_20, %c0_21] : memref<128x18xf32, #tpu.memory_space<vmem>>, vector<128x18xf32>
      tpu.vector_store %arg7[%c0_20, %c0_21], %22 {strides = array<i32>} : memref<128x18xf32, #tpu.memory_space<vmem>>, vector<128x18xf32>,
    } else {
    }
    return
  }
  func.func @transform_0(%arg0: i32, %arg1: i32) -> (i32, i32) {
    %c0_i32 = arith.constant 0 : i32
    return %arg0, %arg1 : i32, i32
  }
  func.func @transform_1(%arg0: i32, %arg1: i32) -> (i32, i32) {
    %c0_i32 = arith.constant 0 : i32
    %c0_i32_0 = arith.constant 0 : i32
    return %arg1, %c0_i32 : i32, i32
  }
  func.func @transform_2(%arg0: i32, %arg1: i32) -> (i32, i32) {
    %c0_i32 = arith.constant 0 : i32
    %c0_i32_0 = arith.constant 0 : i32
    %c0_i32_1 = arith.constant 0 : i32
    return %c0_i32, %c0_i32_0 : i32, i32
  }
  func.func @transform_3(%arg0: i32, %arg1: i32) -> (i32, i32) {
    %c0_i32 = arith.constant 0 : i32
    %c0_i32_0 = arith.constant 0 : i32
    %c0_i32_1 = arith.constant 0 : i32
    return %c0_i32, %c0_i32_0 : i32, i32
  }
  func.func @transform_4(%arg0: i32, %arg1: i32) -> (i32, i32) {
    %c0_i32 = arith.constant 0 : i32
    %c0_i32_0 = arith.constant 0 : i32
    %c0_i32_1 = arith.constant 0 : i32
    return %c0_i32, %c0_i32_0 : i32, i32
  }
  func.func @transform_5(%arg0: i32, %arg1: i32) -> (i32, i32) {
    %c0_i32 = arith.constant 0 : i32
    %c0_i32_0 = arith.constant 0 : i32
    return %arg0, %c0_i32 : i32, i32
  }
}

</mosaic_0001>

<bundles_post_ra>
// kernel: tpu_custom_call.1
= control target key start
LH: loop header
LB: loop body
LE: loop exit
PB: predicated region body
PF: predicated region fallthrough
CT: control target
= control target key end

     0   :  { %10 = vsyncpa [#allocation4], 0  ;;  %s1459_s0 = inlined_call_operand.hbm [shape: f32[256,256], index: 0, kind: input, shape index: {}]   ;;  %s1460_s1 = inlined_call_operand.vmem [shape: f32[256,32], index: 1, kind: input, shape index: {}]   ;;  %s1461_s2 = inlined_call_operand.vmem [shape: f32[1,32], index: 2, kind: input, shape index: {}]   ;;  %s1462_s3 = inlined_call_operand.vmem [shape: f32[32,18], index: 3, kind: input, shape index: {}]   ;;  %s1463_s4 = inlined_call_operand.vmem [shape: f32[1,18], index: 4, kind: input, shape index: {}]   ;;  %s1464_s5 = inlined_call_operand.vmem [shape: f32[256,18], index: 5, kind: output, shape index: {}]  }
   0x1   :  { %12 = vsyncpa [#allocation4 + $0x1], 0  ;;  %s1084_s18 = smov 0   ;;  %s1086_s19 = smov 0  }
   0x2   :  { %s1088_s20 = smov 0   ;;  %s1090_s21 = smov 0  }
   0x3   :  { %s1092_s22 = smov 0   ;;  %s1094_s23 = smov 0  }
   0x4 LB: > { %s840_s24 = sadd.s32 4294967295, %s1049_s23   ;;  %s30_s25 = sadd.s32 1, %s1045_s22  ;;  %s1049_s23 = sphi %s1094_s23, %s18_s23   ;;  %s1045_s22 = sphi %s1092_s22, %s1471_s22   ;;  %s1041_s21 = sphi %s1090_s21, %s1470_s21   ;;  %s1037_s20 = sphi %s1088_s20, %s1469_s20   ;;  %s1033_s19 = sphi %s1086_s19, %s1468_s19   ;;  %s1029_s18 = sphi %s1084_s18, %s1467_s18  }
   0x5   : > { %p32_p0 = scmp.ge.s32.totalorder %s30_s25, 2  ;;  %s39_s26 = sadd.s32 1, %s1037_s20 }
   0x6   : > { %p46_p1 = scmp.ne.s32.totalorder %s1037_s20, %s1033_s19  ;;  %p47_p2 = scmp.eq.s32.totalorder %s1049_s23, 0 }
   0x7   : > { %s1473_s25 = smov (%p32_p0, %s30_s25), 0  ;;  %p52_p4 = scmp.ne.s32.totalorder %s1033_s19, %s1029_s18 }
   0x8   : > { %p1120_p3 = por %p47_p2, %p46_p1  ;;  %s34_s28 = ssub.s32 %s1045_s22, %s1473_s25 }
   0x9   : > { %p53_p5 = scmp.eq.s32.totalorder %s840_s24, 0  ;;  %p37_p6 = scmp.eq.s32.totalorder %s34_s28, 0 }
   0xa   : > { %p915_p8 = scmp.lt.s32.totalorder %s1049_s23, 2  ;;  %s209_s6 = sand.u32 1, %s1037_s20  }
   0xb   : > { %p1127_p7 = por %p53_p5, %p52_p4  ;;  %s872_s7 = sshll.u32 %s1045_s22, 8 }
   0xc   : > { %s1133_s30 = scalar_select %p37_p6, %s1037_s20, %s39_s26  }
   0xd   : > { %s845_s8 = sshll.u32 %s209_s6, 8  ;;  %s221_s11 = scalar_lea.hbm %s1459_s0, %s872_s7 }
   0xe   : > { %s222_s12 = sshll.u32 %s221_s11, 4  ;;  %s213_s13 = scalar_lea.vmem [#allocation3], %s845_s8  ;;  %s223_s12 = int_to_ptr.hbm [resolvable:$true] %s222_s12 }
   0xf   : > { %s224_s14 = sshll.u32 %s213_s13, 4  ;;  %p912_p9 = pnand %p915_p8, %p1120_p3  ;;  %s225_s14 = int_to_ptr.vmem [resolvable:$true] %s224_s14 }
  0x10   : > { %p849_p10 = scmp.ge.s32.totalorder %s1049_s23, 1  ;;  %p232_p11 = scmp.lt.s32.totalorder %s1049_s23, 3 }
  0x11   : > { %s210_s15 = scalar_lea.sflag [#allocation4], %s209_s6  ;;  %s1051_s16 = smov 256  }
  0x12   : > { %s1052_s17 = smov 16   ;;  %p233_p12 = pnand %p849_p10, %p232_p11 }
  0x13   : > { %914 = dma.hbm_to_vmem [thread:$0]  (!%p912_p9), %s223_s12, 4096, %s225_s14, %s210_s15, %s1051_s16, %s1051_s16, %s1052_s17  }
  0x14   : > { %236 = sbr.rel (%p233_p12) target bundleno = 448 (0x1c0), region = 40  ;;  %s238_s18 = sand.u32 (!%p233_p12), 1, %s1033_s19  }
  0x15   : > { %s850_s24 = sshll.u32 (!%p233_p12), %s238_s18, 8  ;;  %s239_s26 = scalar_lea.sflag (!%p233_p12), [#allocation4], %s238_s18 }
  0x16   : > { %s1145_s28 = scalar_lea.vmem (!%p233_p12), [#allocation3], %s850_s24 }
  0x19   : > { %1024 = dma.done.wait (%p1127_p7), %s239_s26, 4096  }
  0x1a   : > { %1026 = vsyncadd (%p1127_p7), %s239_s26, 4294963200  ;;  %v325_v0 = vld [vmem:[%s1460_s1 + $0x78] sm:$0xff]  ;;  %v324_v2 = vld [vmem:[%s1460_s1 + $0x70] sm:$0xff]  ;;  %vm293_vm0 = vcmask 261120   ;;  %s851_s10 = sshll.u32 %s1041_s21, 4  ;;  %vm729_vm1 = vcmask 146432  }
  0x1b   : > { %v1157_v1 = vld [vmem:[%s1460_s1 + $0xf8] sm:$0xff]  ;;  %390 = vmatpush.msra.mxu0 %v325_v0  ;;  %v1166_v3 = vld [vmem:[%s1460_s1 + $0xf0] sm:$0xff]  ;;  %v323_v4 = vld [vmem:[%s1460_s1 + $0x68] sm:$0xff]  ;;  %873 = vmatpush.msra.mxu3 %v325_v0  ;;  %v1053_v0 = vmov 0.0   ;;  %p284_p13 = scmp.lt.s32.totalorder %s851_s10, 31 }
  0x1c   : > { %455 = vmatpush.msra.mxu1 %v1157_v1  ;;  %v1174_v5 = vld [vmem:[%s1460_s1 + $0xe8] sm:$0xff]  ;;  %v322_v6 = vld [vmem:[%s1460_s1 + $0x60] sm:$0xff]  ;;  %v321_v8 = vld [vmem:[%s1460_s1 + $0x58] sm:$0xff]  ;;  %294 = vst.msk [vmem:[#allocation2] sm:$0xff] %vm293_vm0, %v1053_v0 }
  0x1d   : > { %391 = vmatpush.msra.mxu0 %v324_v2  ;;  %v1183_v7 = vld [vmem:[%s1460_s1 + $0xe0] sm:$0xff]  ;;  %874 = vmatpush.msra.mxu3 %v324_v2  ;;  %v1192_v9 = vld [vmem:[%s1460_s1 + $0xd8] sm:$0xff]  ;;  %v320_v10 = vld [vmem:[%s1460_s1 + $0x50] sm:$0xff]  ;;  %295 = vst.msk [vmem:[#allocation2 + $0x8] sm:$0xff] %vm293_vm0, %v1053_v0  ;;  %s1475_s10 = smov (!%p284_p13, %s851_s10), 31 }
  0x1e   : > { %456 = vmatpush.msra.mxu1 %v1166_v3  ;;  %v1201_v11 = vld [vmem:[%s1460_s1 + $0xd0] sm:$0xff]  ;;  %v319_v12 = vld [vmem:[%s1460_s1 + $0x48] sm:$0xff]  ;;  %v318_v14 = vld [vmem:[%s1460_s1 + $0x40] sm:$0xff]  ;;  %296 = vst.msk [vmem:[#allocation2 + $0x10] sm:$0xff] %vm293_vm0, %v1053_v0  ;;  %s852_s11 = sshll.u32 %s1475_s10, 3 }
  0x1f   : > { %392 = vmatpush.msra.mxu0 %v323_v4  ;;  %875 = vmatpush.msra.mxu3 %v323_v4  ;;  %v1210_v13 = vld [vmem:[%s1460_s1 + $0xc8] sm:$0xff]  ;;  %v1219_v15 = vld [vmem:[%s1460_s1 + $0xc0] sm:$0xff]  ;;  %v317_v16 = vld [vmem:[%s1460_s1 + $0x38] sm:$0xff]  ;;  %297 = vst.msk [vmem:[#allocation2 + $0x18] sm:$0xff] %vm293_vm0, %v1053_v0  ;;  %s1407_s15 = scalar_lea.vmem %s1464_s5, %s852_s11 }
  0x20   : > { %457 = vmatpush.msra.mxu1 %v1174_v5  ;;  %v1228_v17 = vld [vmem:[%s1460_s1 + $0xb8] sm:$0xff]  ;;  %v316_v18 = vld [vmem:[%s1460_s1 + $0x30] sm:$0xff]  ;;  %v315_v20 = vld [vmem:[%s1460_s1 + $0x28] sm:$0xff]  ;;  %298 = vst.msk [vmem:[#allocation2 + $0x20] sm:$0xff] %vm293_vm0, %v1053_v0 }
  0x21   : > { %393 = vmatpush.msra.mxu0 %v322_v6  ;;  %876 = vmatpush.msra.mxu3 %v322_v6  ;;  %v1237_v19 = vld [vmem:[%s1460_s1 + $0xb0] sm:$0xff]  ;;  %v331_v21 = vld [vmem:[%s1460_s1 + $0xa8] sm:$0xff]  ;;  %v314_v22 = vld [vmem:[%s1460_s1 + $0x20] sm:$0xff]  ;;  %299 = vst.msk [vmem:[#allocation2 + $0x28] sm:$0xff] %vm293_vm0, %v1053_v0 }
  0x22   : > { %458 = vmatpush.msra.mxu1 %v1183_v7  ;;  %v330_v23 = vld [vmem:[%s1460_s1 + $0xa0] sm:$0xff]  ;;  %v313_v24 = vld [vmem:[%s1460_s1 + $0x18] sm:$0xff]  ;;  %v312_v26 = vld [vmem:[%s1460_s1 + $0x10] sm:$0xff]  ;;  %300 = vst.msk [vmem:[#allocation2 + $0x30] sm:$0xff] %vm293_vm0, %v1053_v0 }
  0x23   : > { %394 = vmatpush.msra.mxu0 %v321_v8  ;;  %877 = vmatpush.msra.mxu3 %v321_v8  ;;  %v329_v25 = vld [vmem:[%s1460_s1 + $0x98] sm:$0xff]  ;;  %v328_v27 = vld [vmem:[%s1460_s1 + $0x90] sm:$0xff]  ;;  %v311_v28 = vld [vmem:[%s1460_s1 + $0x8] sm:$0xff]  ;;  %301 = vst.msk [vmem:[#allocation2 + $0x38] sm:$0xff] %vm293_vm0, %v1053_v0 }
  0x24   : > { %459 = vmatpush.msra.mxu1 %v1192_v9  ;;  %v327_v29 = vld [vmem:[%s1460_s1 + $0x88] sm:$0xff]  ;;  %v310_v30 = vld [vmem:[%s1460_s1] sm:$0xff]  ;;  %v344_v35 = vld [vmem:[%s1145_s28 + $0x10] sm:$0xff]  ;;  %302 = vst.msk [vmem:[#allocation2 + $0x40] sm:$0xff] %vm293_vm0, %v1053_v0 }
  0x25   : > { %395 = vmatpush.msra.mxu0 %v320_v10  ;;  %878 = vmatpush.msra.mxu3 %v320_v10  ;;  %v326_v31 = vld [vmem:[%s1460_s1 + $0x80] sm:$0xff]  ;;  %v343_v33 = vld [vmem:[%s1145_s28 + $0x8] sm:$0xff]  ;;  %v345_v36 = vld [vmem:[%s1145_s28 + $0x18] sm:$0xff]  ;;  %303 = vst.msk [vmem:[#allocation2 + $0x48] sm:$0xff] %vm293_vm0, %v1053_v0 }
  0x26   : > { %460 = vmatpush.msra.mxu1 %v1201_v11  ;;  %v342_v32 = vld [vmem:[%s1145_s28] sm:$0xff]  ;;  %v368_v37 = vld [vmem:[%s1145_s28 + $0xd0] sm:$0xff]  ;;  %v347_v39 = vld [vmem:[%s1145_s28 + $0x28] sm:$0xff]  ;;  %304 = vst.msk [vmem:[#allocation2 + $0x50] sm:$0xff] %vm293_vm0, %v1053_v0 }
  0x27   : > { %396 = vmatpush.msra.mxu0 %v319_v12  ;;  %879 = vmatpush.msra.mxu3 %v319_v12  ;;  %v366_v34 = vld [vmem:[%s1145_s28 + $0xc0] sm:$0xff]  ;;  %v348_v41 = vld [vmem:[%s1145_s28 + $0x30] sm:$0xff]  ;;  %v349_v42 = vld [vmem:[%s1145_s28 + $0x38] sm:$0xff]  ;;  %305 = vst.msk [vmem:[#allocation2 + $0x58] sm:$0xff] %vm293_vm0, %v1053_v0 }
  0x28   : > { %461 = vmatpush.msra.mxu1 %v1210_v13  ;;  %v346_v38 = vld [vmem:[%s1145_s28 + $0x20] sm:$0xff]  ;;  %v372_v43 = vld [vmem:[%s1145_s28 + $0xf0] sm:$0xff]  ;;  %v351_v45 = vld [vmem:[%s1145_s28 + $0x48] sm:$0xff]  ;;  %306 = vst.msk [vmem:[#allocation2 + $0x60] sm:$0xff] %vm293_vm0, %v1053_v0 }
  0x29   : > { %397 = vmatpush.msra.mxu0 %v318_v14  ;;  %880 = vmatpush.msra.mxu3 %v318_v14  ;;  %v370_v40 = vld [vmem:[%s1145_s28 + $0xe0] sm:$0xff]  ;;  %v367_v46 = vld [vmem:[%s1145_s28 + $0xc8] sm:$0xff]  ;;  %v352_v47 = vld [vmem:[%s1145_s28 + $0x50] sm:$0xff]  ;;  %307 = vst.msk [vmem:[#allocation2 + $0x68] sm:$0xff] %vm293_vm0, %v1053_v0 }
  0x2a   : > { %462 = vmatpush.msra.mxu1 %v1219_v15  ;;  %v350_v44 = vld [vmem:[%s1145_s28 + $0x40] sm:$0xff]  ;;  %v353_v48 = vld [vmem:[%s1145_s28 + $0x58] sm:$0xff]  ;;  %v355_v51 = vld [vmem:[%s1145_s28 + $0x68] sm:$0xff]  ;;  %308 = vst.msk [vmem:[#allocation2 + $0x70] sm:$0xff] %vm293_vm0, %v1053_v0 }
  0x2b   : > { %398 = vmatpush.msra.mxu0 %v317_v16  ;;  %881 = vmatpush.msra.mxu3 %v317_v16  ;;  %v369_v49 = vld [vmem:[%s1145_s28 + $0xd8] sm:$0xff]  ;;  %v354_v50 = vld [vmem:[%s1145_s28 + $0x60] sm:$0xff]  ;;  %v371_v52 = vld [vmem:[%s1145_s28 + $0xe8] sm:$0xff]  ;;  %309 = vst.msk [vmem:[#allocation2 + $0x78] sm:$0xff] %vm293_vm0, %v1053_v0 }
  0x2c   : > { %463 = vmatpush.msra.mxu1 %v1228_v17  ;;  %v356_v53 = vld [vmem:[%s1145_s28 + $0x70] sm:$0xff]  ;;  %v357_v54 = vld [vmem:[%s1145_s28 + $0x78] sm:$0xff]  ;;  %v358_v56 = vld [vmem:[%s1145_s28 + $0x80] sm:$0xff] }
  0x2d   : > { %399 = vmatpush.msra.mxu0 %v316_v18  ;;  %882 = vmatpush.msra.mxu3 %v316_v18  ;;  %v373_v55 = vld [vmem:[%s1145_s28 + $0xf8] sm:$0xff]  ;;  %v359_v57 = vld [vmem:[%s1145_s28 + $0x88] sm:$0xff]  ;;  %v360_v58 = vld [vmem:[%s1145_s28 + $0x90] sm:$0xff] }
  0x2e   : > { %464 = vmatpush.msra.mxu1 %v1237_v19  ;;  %v361_v59 = vld [vmem:[%s1145_s28 + $0x98] sm:$0xff]  ;;  %v362_v60 = vld [vmem:[%s1145_s28 + $0xa0] sm:$0xff]  ;;  %v363_v61 = vld [vmem:[%s1145_s28 + $0xa8] sm:$0xff] }
  0x2f   : > { %400 = vmatpush.msra.mxu0 %v315_v20  ;;  %883 = vmatpush.msra.mxu3 %v315_v20  ;;  %v364_v62 = vld [vmem:[%s1145_s28 + $0xb0] sm:$0xff]  ;;  %v365_v63 = vld [vmem:[%s1145_s28 + $0xb8] sm:$0xff]  ;;  %v608_v4 = vld [vmem:[%s1462_s3] sm:$0xff] }
  0x30   : > { %465 = vmatpush.msra.mxu1 %v331_v21  ;;  %v610_v2 = vld [vmem:[%s1462_s3 + $0x10] sm:$0xff]  ;;  %v374_v6 = vld [vmem:[#allocation2] sm:$0xff] }
  0x31   : > { %401 = vmatpush.msra.mxu0 %v314_v22  ;;  %884 = vmatpush.msra.mxu3 %v314_v22  ;;  %v1351_v14 = vld [vmem:[%s1461_s2] ss:$0 sm:$0xff] }
  0x32   : > { %466 = vmatpush.msra.mxu1 %v330_v23 }
  0x33   : > { %402 = vmatpush.msra.mxu0 %v313_v24  ;;  %885 = vmatpush.msra.mxu3 %v313_v24 }
  0x34   : > { %467 = vmatpush.msra.mxu1 %v329_v25 }
  0x35   : > { %403 = vmatpush.msra.mxu0 %v312_v26  ;;  %886 = vmatpush.msra.mxu3 %v312_v26 }
  0x36   : > { %468 = vmatpush.msra.mxu1 %v328_v27 }
  0x37   : > { %404 = vmatpush.msra.mxu0 %v311_v28  ;;  %887 = vmatpush.msra.mxu3 %v311_v28 }
  0x38   : > { %469 = vmatpush.msra.mxu1 %v327_v29 }
  0x39   : > { %405 = vmatpush.msra.mxu0 %v310_v30  ;;  %888 = vmatpush.msra.mxu3 %v310_v30  ;;  %v377_v30 = vld [vmem:[#allocation2 + $0x18] sm:$0xff] }
  0x3a   : > { %470 = vmatpush.msra.mxu1 %v326_v31  ;;  %406 = vmatmul.f32.vlgmr.msra.gmra.mxu0 %v342_v32 }
  0x3b   : > { %471 = vmatmul.f32.vlgmr.msra.gmra.mxu1 %v343_v33  ;;  %442 = vmatmul.f32.vlgmr.msra.gmra.mxu3 %v366_v34 }
  0x3c   : > { %889 = vmatpush.msrb.mxu3 %v1157_v1  ;;  %v611_v1 = vld [vmem:[%s1462_s3 + $0x18] sm:$0xff] }
  0x3d   : > { %676 = vmatpush.msra.mxu2 %v611_v1 }
  0x3e   : > { %890 = vmatpush.msrb.mxu3 %v1166_v3  ;;  %v609_v3 = vld [vmem:[%s1462_s3 + $0x8] sm:$0xff] }
  0x3f   : > { %677 = vmatpush.msra.mxu2 %v610_v2 }
  0x40   : > { %891 = vmatpush.msrb.mxu3 %v1174_v5 }
  0x41   : > { %678 = vmatpush.msra.mxu2 %v609_v3 }
  0x42   : > { %409 = vmatmul.f32.gmra.mxu0 %v344_v35  ;;  %892 = vmatpush.msrb.mxu3 %v1183_v7 }
  0x43   : > { %474 = vmatmul.f32.gmra.mxu1 %v345_v36  ;;  %445 = vmatmul.f32.gmra.mxu3 %v368_v37 }
  0x44   : > { %893 = vmatpush.msrb.mxu3 %v1192_v9  ;;  %679 = vmatpush.msra.mxu2 %v608_v4 }
  0x46   : > { %894 = vmatpush.msrb.mxu3 %v1201_v11  ;;  %v375_v11 = vld [vmem:[#allocation2 + $0x8] sm:$0xff] }
  0x48   : > { %895 = vmatpush.msrb.mxu3 %v1210_v13 }
  0x4a   : > { %412 = vmatmul.f32.gmra.mxu0 %v346_v38  ;;  %896 = vmatpush.msrb.mxu3 %v1219_v15 }
  0x4b   : > { %477 = vmatmul.f32.gmra.mxu1 %v347_v39  ;;  %448 = vmatmul.f32.gmra.mxu3 %v370_v40  ;;  %v378_v39 = vld [vmem:[#allocation2 + $0x20] sm:$0xff] }
  0x4c   : > { %897 = vmatpush.msrb.mxu3 %v1228_v17 }
  0x4e   : > { %898 = vmatpush.msrb.mxu3 %v1237_v19 }
  0x50   : > { %899 = vmatpush.msrb.mxu3 %v331_v21  ;;  %v376_v21 = vld [vmem:[#allocation2 + $0x10] sm:$0xff] }
  0x52   : > { %415 = vmatmul.f32.gmra.mxu0 %v348_v41  ;;  %900 = vmatpush.msrb.mxu3 %v330_v23 }
  0x53   : > { %480 = vmatmul.f32.gmra.mxu1 %v349_v42  ;;  %451 = vmatmul.f32.gmra.mxu3 %v372_v43 }
  0x54   : > { %901 = vmatpush.msrb.mxu3 %v329_v25 }
  0x56   : > { %902 = vmatpush.msrb.mxu3 %v328_v27 }
  0x58   : > { %903 = vmatpush.msrb.mxu3 %v327_v29 }
  0x5a   : > { %418 = vmatmul.f32.gmra.mxu0 %v350_v44  ;;  %904 = vmatpush.msrb.mxu3 %v326_v31 }
  0x5b   : > { %483 = vmatmul.f32.gmra.mxu1 %v351_v45  ;;  %507 = vmatmul.f32.vlgmr.msrb.gmra.mxu3 %v367_v46 }
  0x5c   : > { %905 = vmatpush.msra.mxu3 %v611_v1 }
  0x5e   : > { %906 = vmatpush.msra.mxu3 %v610_v2 }
  0x60   : > { %907 = vmatpush.msra.mxu3 %v609_v3 }
  0x62   : > { %421 = vmatmul.f32.gmra.mxu0 %v352_v47  ;;  %908 = vmatpush.msra.mxu3 %v608_v4 }
  0x63   : > { %486 = vmatmul.f32.gmra.mxu1 %v353_v48  ;;  %510 = vmatmul.f32.gmra.mxu3 %v369_v49  ;;  %v379_v48 = vld [vmem:[#allocation2 + $0x28] sm:$0xff] }
  0x6a   : > { %424 = vmatmul.f32.gmra.mxu0 %v354_v50 }
  0x6b   : > { %489 = vmatmul.f32.gmra.mxu1 %v355_v51  ;;  %513 = vmatmul.f32.gmra.mxu3 %v371_v52  ;;  %v386_v51 = vld [vmem:[#allocation2 + $0x60] sm:$0xff] }
  0x72   : > { %427 = vmatmul.f32.gmra.mxu0 %v356_v53 }
  0x73   : > { %492 = vmatmul.f32.gmra.mxu1 %v357_v54  ;;  %516 = vmatmul.f32.gmra.mxu3 %v373_v55 }
  0x7a   : > { %430 = vmatmul.f32.gmra.mxu0 %v358_v56 }
  0x7b   : > { %495 = vmatmul.f32.gmra.mxu1 %v359_v57 }
  0x82   : > { %433 = vmatmul.f32.gmra.mxu0 %v360_v58 }
  0x83   : > { %498 = vmatmul.f32.gmra.mxu1 %v361_v59 }
  0x8a   : > { %436 = vmatmul.f32.gmra.mxu0 %v362_v60  ;;  %v380_v60 = vld [vmem:[#allocation2 + $0x30] sm:$0xff] }
  0x8b   : > { %501 = vmatmul.f32.gmra.mxu1 %v363_v61 }
  0x92   : > { %439 = vmatmul.f32.gmra.mxu0 %v364_v62 }
  0x93   : > { %504 = vmatmul.f32.gmra.mxu1 %v365_v63  ;;  %v387_v63 = vld [vmem:[#allocation2 + $0x68] sm:$0xff] }
  0xb7   : > { %v407_v5 = vpop.f32.mrf.mxu0 }
  0xb8   : > { %v472_v7 = vpop.f32.mrf.mxu1 }
  0xb9   : > { %v473_v8 = vadd.f32 %v472_v7, %v407_v5 }
  0xbb   : > { %v520_v9 = vadd.f32 %v473_v8, %v374_v6  ;;  %v381_v8 = vld [vmem:[#allocation2 + $0x38] sm:$0xff] }
  0xbd   : > { %537 = vst.msk [vmem:[#allocation2] sm:$0xff] %vm293_vm0, %v520_v9 }
  0xbe   : > { %v443_v15 = vpop.f32.mrf.mxu3 }
  0xbf   : > { %v410_v10 = vpop.f32.mrf.mxu0 }
  0xc0   : > { %v475_v12 = vpop.f32.mrf.mxu1 }
  0xc1   : > { %v476_v13 = vadd.f32 %v475_v12, %v410_v10 }
  0xc3   : > { %v521_v16 = vadd.f32 %v476_v13, %v375_v11  ;;  %v388_v11 = vld [vmem:[#allocation2 + $0x70] sm:$0xff] }
  0xc4   : > { %v556_v17 = vld [vmem:[#allocation2] sm:$0xff] }
  0xc5   : > { %538 = vst.msk [vmem:[#allocation2 + $0x8] sm:$0xff] %vm293_vm0, %v521_v16  ;;  %v576_v18 = vadd.f32 %v1351_v14, %v556_v17 }
  0xc6   : > { %v446_v24 = vpop.f32.mrf.mxu3 }
  0xc7   : > { %v592_v19 = vmax.f32 %v576_v18, 0.0  ;;  %v413_v20 = vpop.f32.mrf.mxu0 }
  0xc8   : > { %v478_v22 = vpop.f32.mrf.mxu1 }
  0xc9   : > { %v479_v23 = vadd.f32 %v478_v22, %v413_v20  ;;  %853 = vmatmul.msk.f32.vlgmr.msra.gmra.mxu2 %vm293_vm0, %v592_v19 }
  0xcb   : > { %v522_v25 = vadd.f32 %v479_v23, %v376_v21  ;;  %v382_v21 = vld [vmem:[#allocation2 + $0x40] sm:$0xff] }
  0xcc   : > { %v557_v26 = vld [vmem:[#allocation2 + $0x8] sm:$0xff] }
  0xcd   : > { %539 = vst.msk [vmem:[#allocation2 + $0x10] sm:$0xff] %vm293_vm0, %v522_v25  ;;  %v577_v27 = vadd.f32 %v1351_v14, %v557_v26 }
  0xce   : > { %v449_v33 = vpop.f32.mrf.mxu3 }
  0xcf   : > { %v593_v28 = vmax.f32 %v577_v27, 0.0  ;;  %v416_v29 = vpop.f32.mrf.mxu0 }
  0xd0   : > { %v481_v31 = vpop.f32.mrf.mxu1 }
  0xd1   : > { %v482_v32 = vadd.f32 %v481_v31, %v416_v29  ;;  %854 = vmatmul.msk.f32.gmra.mxu2 %vm293_vm0, %v593_v28 }
  0xd3   : > { %v523_v34 = vadd.f32 %v482_v32, %v377_v30 }
  0xd4   : > { %v558_v35 = vld [vmem:[#allocation2 + $0x10] sm:$0xff] }
  0xd5   : > { %540 = vst.msk [vmem:[#allocation2 + $0x18] sm:$0xff] %vm293_vm0, %v523_v34  ;;  %v578_v36 = vadd.f32 %v1351_v14, %v558_v35 }
  0xd6   : > { %v452_v42 = vpop.f32.mrf.mxu3 }
  0xd7   : > { %v594_v37 = vmax.f32 %v578_v36, 0.0  ;;  %v419_v38 = vpop.f32.mrf.mxu0 }
  0xd8   : > { %v484_v40 = vpop.f32.mrf.mxu1 }
  0xd9   : > { %v485_v41 = vadd.f32 %v484_v40, %v419_v38  ;;  %855 = vmatmul.msk.f32.gmra.mxu2 %vm293_vm0, %v594_v37 }
  0xdb   : > { %v524_v43 = vadd.f32 %v485_v41, %v378_v39 }
  0xdc   : > { %v559_v44 = vld [vmem:[#allocation2 + $0x18] sm:$0xff] }
  0xdd   : > { %541 = vst.msk [vmem:[#allocation2 + $0x20] sm:$0xff] %vm293_vm0, %v524_v43  ;;  %v579_v45 = vadd.f32 %v1351_v14, %v559_v44  ;;  %v384_v43 = vld [vmem:[#allocation2 + $0x50] sm:$0xff] }
  0xde   : > { %v508_v52 = vpop.f32.mrf.mxu3 }
  0xdf   : > { %v595_v46 = vmax.f32 %v579_v45, 0.0  ;;  %v422_v47 = vpop.f32.mrf.mxu0  ;;  %v509_v53 = vadd.f32 %v508_v52, %v443_v15  ;;  %v385_v52 = vld [vmem:[#allocation2 + $0x58] sm:$0xff] }
  0xe0   : > { %v487_v49 = vpop.f32.mrf.mxu1 }
  0xe1   : > { %v488_v50 = vadd.f32 %v487_v49, %v422_v47  ;;  %856 = vmatmul.msk.f32.gmra.mxu2 %vm293_vm0, %v595_v46  ;;  %v532_v56 = vadd.f32 %v509_v53, %v386_v51 }
  0xe3   : > { %v525_v54 = vadd.f32 %v488_v50, %v379_v48  ;;  %549 = vst.msk [vmem:[#allocation2 + $0x60] sm:$0xff] %vm293_vm0, %v532_v56 }
  0xe4   : > { %v560_v55 = vld [vmem:[#allocation2 + $0x20] sm:$0xff] }
  0xe5   : > { %542 = vst.msk [vmem:[#allocation2 + $0x28] sm:$0xff] %vm293_vm0, %v525_v54  ;;  %v580_v57 = vadd.f32 %v1351_v14, %v560_v55 }
  0xe6   : > { %v511_v0 = vpop.f32.mrf.mxu3 }
  0xe7   : > { %v596_v58 = vmax.f32 %v580_v57, 0.0  ;;  %v425_v59 = vpop.f32.mrf.mxu0  ;;  %v512_v1 = vadd.f32 %v511_v0, %v446_v24  ;;  %v389_v24 = vld [vmem:[#allocation2 + $0x78] sm:$0xff] }
  0xe8   : > { %v490_v61 = vpop.f32.mrf.mxu1 }
  0xe9   : > { %v491_v62 = vadd.f32 %v490_v61, %v425_v59  ;;  %857 = vmatmul.msk.f32.gmra.mxu2 %vm293_vm0, %v596_v58  ;;  %v533_v4 = vadd.f32 %v512_v1, %v387_v63 }
  0xeb   : > { %v526_v2 = vadd.f32 %v491_v62, %v380_v60  ;;  %550 = vst.msk [vmem:[#allocation2 + $0x68] sm:$0xff] %vm293_vm0, %v533_v4  ;;  %v568_v62 = vld [vmem:[#allocation2 + $0x60] sm:$0xff] }
  0xec   : > { %v561_v3 = vld [vmem:[#allocation2 + $0x28] sm:$0xff]  ;;  %v588_v63 = vadd.f32 %v1351_v14, %v568_v62 }
  0xed   : > { %543 = vst.msk [vmem:[#allocation2 + $0x30] sm:$0xff] %vm293_vm0, %v526_v2  ;;  %v581_v5 = vadd.f32 %v1351_v14, %v561_v3 }
  0xee   : > { %v514_v12 = vpop.f32.mrf.mxu3  ;;  %v604_v0 = vmax.f32 %v588_v63, 0.0 }
  0xef   : > { %v597_v6 = vmax.f32 %v581_v5, 0.0  ;;  %v428_v7 = vpop.f32.mrf.mxu0  ;;  %v515_v13 = vadd.f32 %v514_v12, %v449_v33  ;;  %v383_v33 = vld [vmem:[#allocation2 + $0x48] sm:$0xff] }
  0xf0   : > { %v493_v9 = vpop.f32.mrf.mxu1 }
  0xf1   : > { %v494_v10 = vadd.f32 %v493_v9, %v428_v7  ;;  %858 = vmatmul.msk.f32.gmra.mxu2 %vm293_vm0, %v597_v6  ;;  %v534_v17 = vadd.f32 %v515_v13, %v388_v11  ;;  %v968_v7 = vld [vmem:[%s1463_s4] ss:$0 sm:$0xff] }
  0xf2   : > { %v569_v1 = vld [vmem:[#allocation2 + $0x68] sm:$0xff] }
  0xf3   : > { %v527_v15 = vadd.f32 %v494_v10, %v381_v8  ;;  %551 = vst.msk [vmem:[#allocation2 + $0x70] sm:$0xff] %vm293_vm0, %v534_v17  ;;  %v589_v2 = vadd.f32 %v1351_v14, %v569_v1 }
  0xf4   : > { %v562_v16 = vld [vmem:[#allocation2 + $0x30] sm:$0xff] }
  0xf5   : > { %544 = vst.msk [vmem:[#allocation2 + $0x38] sm:$0xff] %vm293_vm0, %v527_v15  ;;  %v582_v18 = vadd.f32 %v1351_v14, %v562_v16  ;;  %v605_v3 = vmax.f32 %v589_v2, 0.0 }
  0xf6   : > { %v517_v25 = vpop.f32.mrf.mxu3 }
  0xf7   : > { %v598_v19 = vmax.f32 %v582_v18, 0.0  ;;  %v431_v20 = vpop.f32.mrf.mxu0  ;;  %v518_v26 = vadd.f32 %v517_v25, %v452_v42 }
  0xf8   : > { %v496_v22 = vpop.f32.mrf.mxu1 }
  0xf9   : > { %v497_v23 = vadd.f32 %v496_v22, %v431_v20  ;;  %859 = vmatmul.msk.f32.gmra.mxu2 %vm293_vm0, %v598_v19  ;;  %v535_v29 = vadd.f32 %v518_v26, %v389_v24 }
  0xfa   : > { %v570_v4 = vld [vmem:[#allocation2 + $0x70] sm:$0xff] }
  0xfb   : > { %v528_v27 = vadd.f32 %v497_v23, %v382_v21  ;;  %552 = vst.msk [vmem:[#allocation2 + $0x78] sm:$0xff] %vm293_vm0, %v535_v29  ;;  %v590_v5 = vadd.f32 %v1351_v14, %v570_v4 }
  0xfc   : > { %v563_v28 = vld [vmem:[#allocation2 + $0x38] sm:$0xff] }
  0xfd   : > { %545 = vst.msk [vmem:[#allocation2 + $0x40] sm:$0xff] %vm293_vm0, %v528_v27  ;;  %v583_v30 = vadd.f32 %v1351_v14, %v563_v28  ;;  %v606_v6 = vmax.f32 %v590_v5, 0.0 }
  0xff   : > { %v599_v31 = vmax.f32 %v583_v30, 0.0  ;;  %v434_v32 = vpop.f32.mrf.mxu0 }
 0x100   : > { %v499_v34 = vpop.f32.mrf.mxu1 }
 0x101   : > { %v500_v35 = vadd.f32 %v499_v34, %v434_v32  ;;  %860 = vmatmul.msk.f32.gmra.mxu2 %vm293_vm0, %v599_v31 }
 0x102   : > { %v571_v39 = vld [vmem:[#allocation2 + $0x78] sm:$0xff] }
 0x103   : > { %v529_v36 = vadd.f32 %v500_v35, %v383_v33  ;;  %v591_v40 = vadd.f32 %v1351_v14, %v571_v39 }
 0x104   : > { %v564_v37 = vld [vmem:[#allocation2 + $0x40] sm:$0xff] }
 0x105   : > { %546 = vst.msk [vmem:[#allocation2 + $0x48] sm:$0xff] %vm293_vm0, %v529_v36  ;;  %v584_v38 = vadd.f32 %v1351_v14, %v564_v37  ;;  %v607_v45 = vmax.f32 %v591_v40, 0.0 }
 0x107   : > { %v600_v41 = vmax.f32 %v584_v38, 0.0  ;;  %v437_v42 = vpop.f32.mrf.mxu0  ;;  %868 = vmatmul.msk.f32.vlgmr.msra.gmra.mxu3 %vm293_vm0, %v607_v45 }
 0x108   : > { %v502_v44 = vpop.f32.mrf.mxu1 }
 0x109   : > { %v503_v46 = vadd.f32 %v502_v44, %v437_v42  ;;  %861 = vmatmul.msk.f32.gmra.mxu2 %vm293_vm0, %v600_v41 }
 0x10b   : > { %v530_v47 = vadd.f32 %v503_v46, %v384_v43 }
 0x10c   : > { %v565_v48 = vld [vmem:[#allocation2 + $0x48] sm:$0xff] }
 0x10d   : > { %547 = vst.msk [vmem:[#allocation2 + $0x50] sm:$0xff] %vm293_vm0, %v530_v47  ;;  %v585_v49 = vadd.f32 %v1351_v14, %v565_v48 }
 0x10f   : > { %v601_v50 = vmax.f32 %v585_v49, 0.0  ;;  %v440_v51 = vpop.f32.mrf.mxu0 }
 0x110   : > { %v505_v53 = vpop.f32.mrf.mxu1 }
 0x111   : > { %v506_v54 = vadd.f32 %v505_v53, %v440_v51  ;;  %862 = vmatmul.msk.f32.gmra.mxu2 %vm293_vm0, %v601_v50 }
 0x113   : > { %v531_v55 = vadd.f32 %v506_v54, %v385_v52 }
 0x114   : > { %v566_v56 = vld [vmem:[#allocation2 + $0x50] sm:$0xff] }
 0x115   : > { %548 = vst.msk [vmem:[#allocation2 + $0x58] sm:$0xff] %vm293_vm0, %v531_v55  ;;  %v586_v57 = vadd.f32 %v1351_v14, %v566_v56 }
 0x117   : > { %v602_v58 = vmax.f32 %v586_v57, 0.0 }
 0x119   : > { %863 = vmatmul.msk.f32.gmra.mxu2 %vm293_vm0, %v602_v58 }
 0x11c   : > { %v567_v59 = vld [vmem:[#allocation2 + $0x58] sm:$0xff] }
 0x11d   : > { %v587_v60 = vadd.f32 %v1351_v14, %v567_v59 }
 0x11f   : > { %v603_v61 = vmax.f32 %v587_v60, 0.0 }
 0x121   : > { %864 = vmatmul.msk.f32.gmra.mxu2 %vm293_vm0, %v603_v61 }
 0x129   : > { %865 = vmatmul.msk.f32.gmra.mxu2 %vm293_vm0, %v604_v0 }
 0x131   : > { %866 = vmatmul.msk.f32.gmra.mxu2 %vm293_vm0, %v605_v3 }
 0x139   : > { %867 = vmatmul.msk.f32.gmra.mxu2 %vm293_vm0, %v606_v6 }
 0x14c   : > { %v681_v14 = vpop.f32.mrf.mxu2 }
 0x14d   : > { %v682_v8 = vadd.f32 %v968_v7, %v681_v14 }
 0x14f   : > { %730 = vst.msk [vmem:[%s1407_s15] sm:$0xff] %vm729_vm1, %v682_v8 }
 0x154   : > { %v684_v9 = vpop.f32.mrf.mxu2 }
 0x155   : > { %v685_v10 = vadd.f32 %v968_v7, %v684_v9 }
 0x157   : > { %731 = vst.msk [vmem:[%s1407_s15 + $0x8] sm:$0xff] %vm729_vm1, %v685_v10 }
 0x15c   : > { %v687_v11 = vpop.f32.mrf.mxu2 }
 0x15d   : > { %v688_v12 = vadd.f32 %v968_v7, %v687_v11 }
 0x15f   : > { %732 = vst.msk [vmem:[%s1407_s15 + $0x10] sm:$0xff] %vm729_vm1, %v688_v12 }
 0x164   : > { %v690_v13 = vpop.f32.mrf.mxu2 }
 0x165   : > { %v691_v15 = vadd.f32 %v968_v7, %v690_v13 }
 0x167   : > { %733 = vst.msk [vmem:[%s1407_s15 + $0x18] sm:$0xff] %vm729_vm1, %v691_v15 }
 0x16c   : > { %v693_v16 = vpop.f32.mrf.mxu2 }
 0x16d   : > { %v694_v17 = vadd.f32 %v968_v7, %v693_v16 }
 0x16f   : > { %734 = vst.msk [vmem:[%s1407_s15 + $0x20] sm:$0xff] %vm729_vm1, %v694_v17 }
 0x174   : > { %v696_v18 = vpop.f32.mrf.mxu2 }
 0x175   : > { %v697_v19 = vadd.f32 %v968_v7, %v696_v18 }
 0x177   : > { %735 = vst.msk [vmem:[%s1407_s15 + $0x28] sm:$0xff] %vm729_vm1, %v697_v19 }
 0x17c   : > { %v699_v20 = vpop.f32.mrf.mxu2 }
 0x17d   : > { %v700_v21 = vadd.f32 %v968_v7, %v699_v20 }
 0x17f   : > { %736 = vst.msk [vmem:[%s1407_s15 + $0x30] sm:$0xff] %vm729_vm1, %v700_v21 }
 0x184   : > { %v702_v22 = vpop.f32.mrf.mxu2 }
 0x185   : > { %v703_v23 = vadd.f32 %v968_v7, %v702_v22 }
 0x187   : > { %737 = vst.msk [vmem:[%s1407_s15 + $0x38] sm:$0xff] %vm729_vm1, %v703_v23 }
 0x18a   : > { %v726_v26 = vpop.f32.mrf.mxu3 }
 0x18b   : > { %v727_v27 = vadd.f32 %v968_v7, %v726_v26 }
 0x18c   : > { %v705_v24 = vpop.f32.mrf.mxu2 }
 0x18d   : > { %v706_v25 = vadd.f32 %v968_v7, %v705_v24  ;;  %745 = vst.msk [vmem:[%s1407_s15 + $0x78] sm:$0xff] %vm729_vm1, %v727_v27 }
 0x18f   : > { %738 = vst.msk [vmem:[%s1407_s15 + $0x40] sm:$0xff] %vm729_vm1, %v706_v25 }
 0x194   : > { %v708_v28 = vpop.f32.mrf.mxu2 }
 0x195   : > { %v709_v29 = vadd.f32 %v968_v7, %v708_v28 }
 0x197   : > { %739 = vst.msk [vmem:[%s1407_s15 + $0x48] sm:$0xff] %vm729_vm1, %v709_v29 }
 0x19c   : > { %v711_v30 = vpop.f32.mrf.mxu2 }
 0x19d   : > { %v712_v31 = vadd.f32 %v968_v7, %v711_v30 }
 0x19f   : > { %740 = vst.msk [vmem:[%s1407_s15 + $0x50] sm:$0xff] %vm729_vm1, %v712_v31 }
 0x1a4   : > { %v714_v32 = vpop.f32.mrf.mxu2 }
 0x1a5   : > { %v715_v33 = vadd.f32 %v968_v7, %v714_v32 }
 0x1a7   : > { %741 = vst.msk [vmem:[%s1407_s15 + $0x58] sm:$0xff] %vm729_vm1, %v715_v33 }
 0x1ac   : > { %v717_v34 = vpop.f32.mrf.mxu2 }
 0x1ad   : > { %v718_v35 = vadd.f32 %v968_v7, %v717_v34 }
 0x1af   : > { %742 = vst.msk [vmem:[%s1407_s15 + $0x60] sm:$0xff] %vm729_vm1, %v718_v35 }
 0x1b4   : > { %v720_v36 = vpop.f32.mrf.mxu2 }
 0x1b5   : > { %v721_v37 = vadd.f32 %v968_v7, %v720_v36 }
 0x1b7   : > { %743 = vst.msk [vmem:[%s1407_s15 + $0x68] sm:$0xff] %vm729_vm1, %v721_v37 }
 0x1bc   : > { %v723_v38 = vpop.f32.mrf.mxu2 }
 0x1bd   : > { %v724_v39 = vadd.f32 %v968_v7, %v723_v38 }
 0x1bf   : > { %744 = vst.msk [vmem:[%s1407_s15 + $0x70] sm:$0xff] %vm729_vm1, %v724_v39 }
 0x1c0 PF: > { %s18_s23 = sadd.s32 1, %s1049_s23   ;;  %s1467_s18 = smov %s1033_s19 }
 0x1c1   : > { %p15_p0 = scmp.ge.s32.totalorder %s18_s23, 4   ;;  %s1468_s19 = smov %s1037_s20 }
 0x1c2   : > { %s1469_s20 = smov %s1133_s30  ;;  %s1470_s21 = smov %s1045_s22 }
 0x1c3   : > { %s1471_s22 = smov %s1473_s25  ;;  %17 = sbr.rel (!%p15_p0) target bundleno = 4 (0x4), region = 91 }
 0x1c8   :  { %768 = vsyncpa [#allocation4], 1 }
 0x1c9   :  { %770 = vsyncpa [#allocation4 + $0x1], 1 }

</bundles_post_ra>
